<compile_context>
chip_gen: v6e
topology: v6e:2x2x1
jax: 0.10.0
libtpu: 0.0.40
codegen_flags: <defaults>
</compile_context>

<pallas_src>
import functools
import math

import jax
import jax.numpy as jnp
import numpy as np
from jax.experimental import pallas as pl
from jax.experimental.pallas import tpu as pltpu


def _round_up(x: int, m: int) -> int:
    return ((x + m - 1) // m) * m


def _cdiv(a: int, b: int) -> int:
    return -(-a // b)


def _fold_factor(num_basis_functions: int) -> int:
    """Edges folded per kernel row.

    Constraints / targets:
      * F*K must be a multiple of 128 so the folded output row is lane-dense and the
        (rows, F*K) -> (N, K) reshape is free (row-major contiguity preserved).
      * F >= 32 so per-edge transcendentals use >= 32 of 128 lanes per vreg (EUP density),
        while keeping the fused HIGHEST-precision expansion matmul (contraction = 3F)
        cheap enough to stay near the HBM roofline on v5e.
    """
    g = 128 // math.gcd(num_basis_functions, 128)   # minimum fold for lane-dense output
    return g * _cdiv(32, g)                          # smallest multiple of g that is >= 32


def _make_coeff_table(num_basis_functions: int, fold: int) -> jax.Array:
    """Constant table: fused expansion weights + logc bias row.

    Rows 0..F-1     : W_x,  W_x [j, j*K + k] = n[k]     (expand x,  scaled by n)
    Rows F..2F-1    : W_l1, W_l1[j, j*K + k] = v[k]     (expand l1, scaled by v)
    Rows 2F..3F-1   : W_fc, W_fc[j, j*K + k] = 1        (expand log_fc)
    Row  3F         : log binomial coefficients tiled F times (bias)
    Remaining rows  : zero padding (row count rounded up to a multiple of 8).
    """
    K = num_basis_functions
    F = fold
    lanes = F * K

    # Coefficients in float64 (as the torch buffers), then cast to float32.
    logfactorial = np.zeros(K, dtype=np.float64)
    for i in range(2, K):
        logfactorial[i] = logfactorial[i - 1] + np.log(i)
    v = np.arange(K, dtype=np.float64)
    n = (K - 1) - v
    logbinomial = (logfactorial[-1]
                   - logfactorial[v.astype(np.int64)]
                   - logfactorial[n.astype(np.int64)])

    expand = np.kron(np.eye(F), np.ones((1, K)))         # (F, F*K), 1 at [j, j*K + k]
    rows = _round_up(3 * F + 1, 8)
    tbl = np.zeros((rows, lanes), dtype=np.float32)
    tbl[0:F] = expand * np.tile(n, F)[None, :]
    tbl[F:2 * F] = expand * np.tile(v, F)[None, :]
    tbl[2 * F:3 * F] = expand
    tbl[3 * F] = np.tile(logbinomial, F)
    return jnp.asarray(tbl)


def _bernstein_kernel(tbl_ref, r_ref, o_ref, *, cutoff: float, fold: int):
    """One tile: r (TR, F) folded edges -> folded output (TR, F*K), lane-dense."""
    F = fold
    r = r_ref[...]                                   # (TR, F) float32, F edges per row

    W = tbl_ref[0:3 * F, :]                          # (3F, F*K) fused expansion weights
    logc = tbl_ref[3 * F:3 * F + 1, :]               # (1, F*K)  log binomial, lane-tiled

    c = jnp.float32(cutoff)
    inv_c = jnp.float32(1.0 / cutoff)
    inside = r < c
    # Keep all logs finite for padded / out-of-range edges; such edges are zeroed below
    # via the lfc sentinel (the torch module would produce NaN here - documented above).
    r_s = jnp.where(inside, r, jnp.float32(0.5) * c)
    r_s = jnp.maximum(r_s, jnp.float32(1e-30))

    # --- Per-edge transcendentals, lane-dense (F >= 32 of 128 lanes per vreg) ---------
    x = jnp.log(r_s * inv_c)                         # log(r / cutoff)
    # log(1 - r/c) as log((c - r)/c): one log, no expm1, exact near the cutoff.
    l1 = jnp.log((c - r_s) * inv_c)
    # Smooth cutoff in log space, fused into the final exp.  Exact divide kept
    # (pl.reciprocal(approx=True) would inject ~2^-12 relative error into fc even at
    # moderate r; the divide is cheap now that the per-edge tile is lane-dense).
    lfc = -(r_s * r_s) / ((c - r_s) * (c + r_s))
    # Finite sentinel: safe through the 0/1 matmul (-inf * 0 would give NaN) yet large
    # enough that exp() flushes masked edges to exactly 0 in float32 (or bf16).
    lfc = jnp.where(inside, lfc, jnp.float32(-1e5))

    # --- One fused MXU expansion + bias + one exp --------------------------------------
    # out[i, j*K + k] = n[k]*x[i,j] + v[k]*l1[i,j] + lfc[i,j] + logc[k]
    lhs = jnp.concatenate([x, l1, lfc], axis=1)      # (TR, 3F)
    log_rbf = jnp.dot(lhs, W,
                      precision=jax.lax.Precision.HIGHEST,   # exact f32 exponent
                      preferred_element_type=jnp.float32) + logc
    o_ref[...] = jnp.exp(log_rbf).astype(o_ref.dtype)


def bernstein_rbf(r: jax.Array, num_basis_functions: int, cutoff: float,
                  *, block_rows: int = 2048, out_dtype=jnp.float32) -> jax.Array:
    """r: (N, 1) distances.  Returns (N, num_basis_functions) in out_dtype (default f32)."""
    assert r.ndim == 2 and r.shape[1] == 1, "expected distances of shape (N, 1)"
    N = r.shape[0]
    K = num_basis_functions
    F = _fold_factor(K)
    lanes = F * K

    tbl = _make_coeff_table(K, F)

    # ---- Tile sizing with an explicit VMEM budget --------------------------------------
    # Bytes per folded row: double-buffered in/out blocks (2*F + 2*F*K floats) plus the
    # dominant in-kernel f32 intermediates (r_s/x/l1/lfc/lhs ~ 6F, matmul result + exp
    # ~ 2*F*K).  Budget ~24 MiB against the 32 MiB scoped limit requested below - safe on
    # every generation (v5e/v6e 128 MiB physical, v7x 64 MiB per TC).
    bytes_per_row = 4 * (8 * F + 4 * F * K)
    cap_rows = max(8, ((24 << 20) // bytes_per_row) // 8 * 8)
    max_rows = max(8, (min(block_rows, cap_rows) // 8) * 8)

    rows_needed = _cdiv(N, F)
    # Megacore: keep >= 2 grid steps whenever there is enough work so that
    # dimension_semantics=("parallel",) can feed both TensorCores on v7x.
    steps_min = 2 if rows_needed >= 16 else 1
    steps = max(steps_min, _cdiv(rows_needed, max_rows))
    br = _round_up(_cdiv(rows_needed, steps), 8)
    rows_padded = steps * br
    n_pad_edges = rows_padded * F

    # Fold r: edge e lives at r_fold[e // F, e % F]; pad with a safe in-range value
    # (padded rows produce finite values that are sliced off below).
    r_flat = jnp.ravel(r).astype(jnp.float32)
    if n_pad_edges != N:
        pad = jnp.full((n_pad_edges - N,), jnp.float32(0.5 * cutoff), dtype=jnp.float32)
        r_flat = jnp.concatenate([r_flat, pad])
    r_fold = r_flat.reshape(rows_padded, F)

    out_fold = pl.pallas_call(
        functools.partial(_bernstein_kernel, cutoff=float(cutoff), fold=F),
        out_shape=jax.ShapeDtypeStruct((rows_padded, lanes), out_dtype),
        grid_spec=pltpu.PrefetchScalarGridSpec(
            num_scalar_prefetch=0,
            grid=(steps,),
            in_specs=[
                pl.BlockSpec(tbl.shape, lambda i: (0, 0)),   # constant coeff table
                pl.BlockSpec((br, F), lambda i: (i, 0)),     # folded distances
            ],
            out_specs=pl.BlockSpec((br, lanes), lambda i: (i, 0)),  # lane-dense output
        ),
        compiler_params=pltpu.CompilerParams(
            dimension_semantics=("parallel",),
            vmem_limit_bytes=32 << 20,
        ),
    )(tbl, r_fold)

    # Free reshape back to (N, K): the folded layout preserves row-major contiguity.
    return out_fold.reshape(rows_padded * F, K)[:N]


def bernstein_rbf_reference(r: jax.Array, num_basis_functions: int, cutoff: float) -> jax.Array:
    """Pure-JAX float32 port of the PyTorch forward (separate fc * exp(log_b))."""
    K = num_basis_functions
    logfactorial = np.zeros(K, dtype=np.float64)
    for i in range(2, K):
        logfactorial[i] = logfactorial[i - 1] + np.log(i)
    v = np.arange(K, dtype=np.float64)
    n = (K - 1) - v
    logbinomial = (logfactorial[-1]
                   - logfactorial[v.astype(np.int64)]
                   - logfactorial[n.astype(np.int64)])
    logc = jnp.asarray(logbinomial, dtype=jnp.float32)[None, :]
    n = jnp.asarray(n, dtype=jnp.float32)[None, :]
    v = jnp.asarray(v, dtype=jnp.float32)[None, :]

    x = jnp.log(r / cutoff)
    log_b = logc + n * x + v * jnp.log(-jnp.expm1(x))
    zeros = jnp.zeros_like(r)
    r_safe = jnp.where(r < cutoff, r, zeros)
    fc = jnp.where(r < cutoff,
                   jnp.exp(-(r_safe ** 2) / ((cutoff - r_safe) * (cutoff + r_safe))),
                   zeros)
    return fc * jnp.exp(log_b)


if __name__ == "__main__":
    num_basis_functions = 16
    cutoff = 5.0

    key = jax.random.PRNGKey(0)

    # Case 1: N divisible by the fold factor (typical use in the model).
    N1 = 128
    r1 = jax.random.uniform(key, (N1, 1), dtype=jnp.float32,
                            minval=0.1, maxval=0.9 * cutoff)
    out1 = jax.block_until_ready(bernstein_rbf(r1, num_basis_functions, cutoff))
    ref1 = bernstein_rbf_reference(r1, num_basis_functions, cutoff)
    assert out1.shape == (N1, num_basis_functions)
    np.testing.assert_allclose(np.asarray(out1), np.asarray(ref1), rtol=2e-4, atol=1e-12)

    # Case 2: ragged N (exercises the padding / fold path).
    N2 = 100
    r2 = jax.random.uniform(jax.random.PRNGKey(1), (N2, 1), dtype=jnp.float32,
                            minval=0.1, maxval=0.9 * cutoff)
    out2 = jax.block_until_ready(bernstein_rbf(r2, num_basis_functions, cutoff))
    ref2 = bernstein_rbf_reference(r2, num_basis_functions, cutoff)
    assert out2.shape == (N2, num_basis_functions)
    np.testing.assert_allclose(np.asarray(out2), np.asarray(ref2), rtol=2e-4, atol=1e-12)

    # Case 3: a point past the cutoff is masked to exactly 0; in-range point still matches.
    r3 = jnp.array([[0.3 * cutoff], [1.5 * cutoff]], dtype=jnp.float32)
    out3 = jax.block_until_ready(bernstein_rbf(r3, num_basis_functions, cutoff))
    assert np.all(np.asarray(out3)[1] == 0.0)
    ref3 = bernstein_rbf_reference(r3[:1], num_basis_functions, cutoff)
    np.testing.assert_allclose(np.asarray(out3)[:1], np.asarray(ref3), rtol=2e-4, atol=1e-12)

    print("KERNEL_OK")
</pallas_src>

<mosaic_0001>
module attributes {stable_mosaic.version = 11 : i64} {
  func.func @_bernstein_kernel(%arg0: i32, %arg1: memref<104x512xf32, #tpu.memory_space<vmem>>, %arg2: memref<8x32xf32, #tpu.memory_space<vmem>>, %arg3: memref<8x512xf32, #tpu.memory_space<vmem>>) attributes {dimension_semantics = [#tpu.dimension_semantics<parallel>], iteration_bounds = array<i64: 1>, scalar_prefetch = 0 : i64, scratch_operands = 0 : i64, tpu.core_type = #tpu.core_type<tc>, window_params = [{pipeline_mode = #tpu.pipeline_mode<synchronous>, transform_indices = @transform_0, window_bounds = array<i64: 104, 512>}, {transform_indices = @transform_1, window_bounds = array<i64: 8, 32>}, {transform_indices = @transform_2, window_bounds = array<i64: 8, 512>}]} {
    %c0 = arith.constant 0 : index
    %c0_0 = arith.constant 0 : index
    %0 = vector.load %arg2[%c0, %c0_0] : memref<8x32xf32, #tpu.memory_space<vmem>>, vector<8x32xf32>
    %c0_1 = arith.constant 0 : index
    %c0_2 = arith.constant 0 : index
    %1 = vector.load %arg1[%c0_1, %c0_2] : memref<104x512xf32, #tpu.memory_space<vmem>>, vector<96x512xf32>
    %c96 = arith.constant 96 : index
    %c0_3 = arith.constant 0 : index
    %2 = vector.load %arg1[%c96, %c0_3] : memref<104x512xf32, #tpu.memory_space<vmem>>, vector<1x512xf32>
    %cst = arith.constant 5.000000e+00 : f32
    %3 = vector.broadcast %cst : f32 to vector<8x32xf32>
    %4 = arith.cmpf olt, %0, %3 : vector<8x32xf32>
    %cst_4 = arith.constant 5.000000e-01 : f32
    %cst_5 = arith.constant 5.000000e+00 : f32
    %5 = arith.mulf %cst_4, %cst_5 : f32
    %6 = vector.broadcast %5 : f32 to vector<8x32xf32>
    %7 = arith.select %4, %0, %6 : vector<8x32xi1>, vector<8x32xf32>
    %cst_6 = arith.constant 1.000000e-30 : f32
    %8 = vector.broadcast %cst_6 : f32 to vector<8x32xf32>
    %9 = arith.maximumf %7, %8 : vector<8x32xf32>
    %cst_7 = arith.constant 2.000000e-01 : f32
    %10 = vector.broadcast %cst_7 : f32 to vector<8x32xf32>
    %11 = arith.mulf %9, %10 : vector<8x32xf32>
    %12 = math.log %11 : vector<8x32xf32>
    %cst_8 = arith.constant 5.000000e+00 : f32
    %13 = vector.broadcast %cst_8 : f32 to vector<8x32xf32>
    %14 = arith.subf %13, %9 : vector<8x32xf32>
    %cst_9 = arith.constant 2.000000e-01 : f32
    %15 = vector.broadcast %cst_9 : f32 to vector<8x32xf32>
    %16 = arith.mulf %14, %15 : vector<8x32xf32>
    %17 = math.log %16 : vector<8x32xf32>
    %18 = arith.mulf %9, %9 : vector<8x32xf32>
    %cst_10 = arith.constant 0.000000e+00 : f32
    %19 = vector.broadcast %cst_10 : f32 to vector<8x32xf32>
    %20 = arith.subf %19, %18 : vector<8x32xf32>
    %cst_11 = arith.constant 5.000000e+00 : f32
    %21 = vector.broadcast %cst_11 : f32 to vector<8x32xf32>
    %22 = arith.subf %21, %9 : vector<8x32xf32>
    %cst_12 = arith.constant 5.000000e+00 : f32
    %23 = vector.broadcast %cst_12 : f32 to vector<8x32xf32>
    %24 = arith.addf %23, %9 : vector<8x32xf32>
    %25 = arith.mulf %22, %24 : vector<8x32xf32>
    %26 = arith.divf %20, %25 : vector<8x32xf32>
    %cst_13 = arith.constant -1.000000e+05 : f32
    %27 = vector.broadcast %cst_13 : f32 to vector<8x32xf32>
    %28 = arith.select %4, %26, %27 : vector<8x32xi1>, vector<8x32xf32>
    %29 = tpu.concatenate %12, %17, %28 in 1 : vector<8x32xf32>, vector<8x32xf32>, vector<8x32xf32> -> vector<8x96xf32>
    %cst_14 = arith.constant dense<0.000000e+00> : vector<8x512xf32>
    %30 = tpu.matmul %29, %1, %cst_14 {dimension_numbers = #tpu.dot_dimension_numbers<[1], [0], [0], [1], [0, 0, 1, 1], [], []>, precision = #tpu.contract_precision<fp32>} : vector<8x96xf32>, vector<96x512xf32>, vector<8x512xf32> -> vector<8x512xf32>
    %31 = vector.broadcast %2 : vector<1x512xf32> to vector<8x512xf32>
    %32 = arith.addf %30, %31 : vector<8x512xf32>
    %33 = math.exp %32 : vector<8x512xf32>
    %c0_15 = arith.constant 0 : index
    %c0_16 = arith.constant 0 : index
    %34 = vector.load %arg3[%c0_15, %c0_16] : memref<8x512xf32, #tpu.memory_space<vmem>>, vector<8x512xf32>
    tpu.vector_store %arg3[%c0_15, %c0_16], %33 {strides = array<i32>} : memref<8x512xf32, #tpu.memory_space<vmem>>, vector<8x512xf32>,
    return
  }
  func.func @transform_0(%arg0: i32) -> (i32, i32) {
    %c0_i32 = arith.constant 0 : i32
    %c0_i32_0 = arith.constant 0 : i32
    %c0_i32_1 = arith.constant 0 : i32
    return %c0_i32, %c0_i32_0 : i32, i32
  }
  func.func @transform_1(%arg0: i32) -> (i32, i32) {
    %c0_i32 = arith.constant 0 : i32
    %c0_i32_0 = arith.constant 0 : i32
    return %arg0, %c0_i32 : i32, i32
  }
  func.func @transform_2(%arg0: i32) -> (i32, i32) {
    %c0_i32 = arith.constant 0 : i32
    %c0_i32_0 = arith.constant 0 : i32
    return %arg0, %c0_i32 : i32, i32
  }
}

</mosaic_0001>

<bundles_post_ra>
// kernel: tpu_custom_call.1
= control target key start
LH: loop header
LB: loop body
LE: loop exit
PB: predicated region body
PF: predicated region fallthrough
CT: control target
= control target key end

     0   :  { %7 = vsyncpa [#allocation3], 0  ;;  %s2591_s0 = inlined_call_operand.hbm [shape: f32[104,512], index: 0, kind: input, shape index: {}]   ;;  %s2592_s1 = inlined_call_operand.hbm [shape: f32[8,32], index: 1, kind: input, shape index: {}]   ;;  %s2593_s2 = inlined_call_operand.hbm [shape: f32[8,512], index: 2, kind: output, shape index: {}]  }
   0x1   :  { %8 = vsyncpa [#allocation6], 0 }
   0x2   :  { %9 = vsyncpa [#allocation4], 0  ;;  %s1760_s9 = smov [#allocation2]  }
   0x3   :  { %s15_s10 = sshll.u32 %s1760_s9, 4  ;;  %s16_s10 = int_to_ptr.vmem [resolvable:$true] %s15_s10 }
   0x4   :  { %s1702_s11 = scalar_lea.vmem %s16_s10, 6656  ;;  %p1707_p1 = scmp.lt.s32.totalorder %s16_s10, %s16_s10 }
   0x5   :  { %p1703_p0 = scmp.ne.s32.totalorder %s16_s10, %s1702_s11  ;;  %p1708_p2 = scmp.lt.s32.totalorder %s1702_s11, %s1702_s11 }
   0x7   :  { %p1709_p3 = por %p1708_p2, %p1707_p1 }
   0x9   :  { %p1710_p4 = pnand %p1709_p3, %p1703_p0 }
   0xb   :  { %1713 = shalt.err (!%p1710_p4)
}
   0xc   :  { %s1761_s12 = smov 512   ;;  %s1762_s13 = smov 32  }
   0xd   :  { %21 = dma.hbm_to_vmem [thread:$0]  %s2591_s0, 6656, %s16_s10, [#allocation3], %s1761_s12, %s1761_s12, %s1762_s13  }
   0xe   :  { %s1763_s16 = smov [#allocation5]  }
   0xf   :  { %s28_s17 = sshll.u32 %s1763_s16, 4  ;;  %s29_s17 = int_to_ptr.vmem [resolvable:$true] %s28_s17 }
  0x10   :  { %s1722_s18 = scalar_lea.vmem %s29_s17, 128  ;;  %p1727_p6 = scmp.lt.s32.totalorder %s29_s17, %s29_s17 }
  0x11   :  { %p1723_p5 = scmp.ne.s32.totalorder %s29_s17, %s1722_s18  ;;  %p1728_p7 = scmp.lt.s32.totalorder %s1722_s18, %s1722_s18 }
  0x13   :  { %p1729_p8 = por %p1728_p7, %p1727_p6 }
  0x15   :  { %p1730_p9 = pnand %p1729_p8, %p1723_p5 }
  0x17   :  { %1733 = shalt.err (!%p1730_p9)
}
  0x18   :  { %31 = dma.hbm_to_vmem [thread:$0]  %s2592_s1, 128, %s29_s17, [#allocation6]  }
  0x19   :  { %1754 = dma.done.wait [#allocation3], 6656  }
  0x1a   :  { %1755 = vsyncadd [#allocation3], 4294960640 }
  0x1b   :  { %1756 = dma.done.wait [#allocation6], 128  }
  0x1c   :  { %1757 = vsyncadd [#allocation6], 4294967168  ;;  %v1789_v0 = vld [vmem:[#allocation5] sm:$0xff]  ;;  %v84_v1 = vld [vmem:[#allocation2 + $0x168] sm:$0xff]  ;;  %s1764_s0 = smov 64   ;;  %vm114_vm1 = vcmask 261120  }
  0x1d   :  { %v83_v2 = vld [vmem:[#allocation2 + $0x160] sm:$0xff]  ;;  %vm89_vm0 = vcmp.lt.f32.partialorder %v1789_v0, 5.0  ;;  %v1792_v3 = vand.u32 4294901760, %v84_v1  ;;  %v80_v5 = vld [vmem:[#allocation2 + $0x148] sm:$0xff]  ;;  %vm116_vm2 = vcmask 523264   ;;  %vm139_vm3 = vcmask 785408  }
  0x1e   :  { %v1794_v4 = vand.u32 4294901760, %v83_v2  ;;  %v79_v6 = vld [vmem:[#allocation2 + $0x140] sm:$0xff]  ;;  %v76_v7 = vld [vmem:[#allocation2 + $0x128] sm:$0xff]  ;;  %v90_v8 = vsel %vm89_vm0, %v1789_v0, 2.5  ;;  %v1799_v9 = vand.u32 4294901760, %v80_v5  ;;  %s1766_s1 = smov [#allocation7]  }
  0x1f   :  { %v1801_v10 = vand.u32 4294901760, %v79_v6  ;;  %v1803_v11 = vand.u32 4294901760, %v76_v7  ;;  %v75_v12 = vld [vmem:[#allocation2 + $0x120] sm:$0xff]  ;;  %v72_v13 = vld [vmem:[#allocation2 + $0x108] sm:$0xff]  ;;  %v1805_v14 = vmax.f32 %v90_v8, 1e-30  ;;  %v1808_v15 = vsub.f32 %v84_v1, %v1792_v3  ;;  %152 = vmatprep.subr.mxu0 %v1792_v3 }
  0x20   :  { %v1811_v16 = vsub.f32 %v83_v2, %v1794_v4  ;;  %v1815_v17 = vsub.f32 %v80_v5, %v1799_v9  ;;  %v1823_v20 = vand.u32 4294901760, %v75_v12  ;;  %154 = vmatpush1.msra.mxu0 %v1794_v4  ;;  %v1829_v24 = vand.u32 4294901760, %v72_v13  ;;  %v71_v37 = vld [vmem:[#allocation2 + $0x100] sm:$0xff]  ;;  %v68_v38 = vld [vmem:[#allocation2 + $0xe8] sm:$0xff]  ;;  %s1663_s21 = sshll.u32 %s1766_s1, 4  ;;  %s1664_s21 = int_to_ptr.vmem [resolvable:$true] %s1663_s21 }
  0x21   :  { %v1818_v18 = vsub.f32 %v79_v6, %v1801_v10  ;;  %v1821_v19 = vsub.f32 %v76_v7, %v1803_v11  ;;  %v95_v21 = vsub.f32 5.0, %v1805_v14  ;;  %v101_v22 = vadd.f32 5.0, %v1805_v14  ;;  %156 = vmatprep.subr.mxu0 %v1799_v9  ;;  %v67_v42 = vld [vmem:[#allocation2 + $0xe0] sm:$0xff]  ;;  %v64_v43 = vld [vmem:[#allocation2 + $0xc8] sm:$0xff]  ;;  %s1734_s22 = scalar_lea.vmem %s1664_s21, 512  ;;  %p1739_p11 = scmp.lt.s32.totalorder %s1664_s21, %s1664_s21 }
  0x22   :  { %v253_v23 = vand.u32 4294901760, %v1808_v15  ;;  %v2614_v25 = vand.u32 4294901760, %v1811_v16  ;;  %v2613_v26 = vand.u32 4294901760, %v1815_v17  ;;  %158 = vmatpush1.msra.mxu0 %v1801_v10  ;;  %v1839_v31 = vmul.f32 %v1805_v14, %v1805_v14  ;;  %v63_v44 = vld [vmem:[#allocation2 + $0xc0] sm:$0xff]  ;;  %v60_v48 = vld [vmem:[#allocation2 + $0xa8] sm:$0xff]  ;;  %p1735_p10 = scmp.ne.s32.totalorder %s1664_s21, %s1734_s22  ;;  %p1740_p12 = scmp.lt.s32.totalorder %s1734_s22, %s1734_s22 }
  0x23   :  { %v2612_v27 = vand.u32 4294901760, %v1818_v18  ;;  %v2607_v28 = vand.u32 4294901760, %v1821_v19  ;;  %v96_v29 = vmul.f32 0.2, %v95_v21  ;;  %v102_v30 = vmul.f32 %v101_v22, %v95_v21  ;;  %160 = vmatprep.subr.mxu0 %v1803_v11  ;;  %v59_v2 = vld [vmem:[#allocation2 + $0xa0] sm:$0xff]  ;;  %v56_v5 = vld [vmem:[#allocation2 + $0x88] sm:$0xff] }
  0x24   :  { %v254_v32 = vsub.f32 %v1808_v15, %v253_v23  ;;  %v260_v33 = vsub.f32 %v1811_v16, %v2614_v25  ;;  %v266_v34 = vsub.f32 %v1815_v17, %v2613_v26  ;;  %162 = vmatpush1.msra.mxu0 %v1823_v20  ;;  %v1859_v40 = vsub.f32 %v75_v12, %v1823_v20  ;;  %v40_v0 = vld [vmem:[#allocation2 + $0x8] sm:$0xff]  ;;  %p1741_p13 = por %p1740_p12, %p1739_p11 }
  0x25   :  { %v272_v35 = vsub.f32 %v1818_v18, %v2612_v27  ;;  %v278_v36 = vsub.f32 %v1821_v19, %v2607_v28  ;;  %1680 = vlog2.f32 %v96_v29  ;;  %v1862_v41 = vsub.f32 %v72_v13, %v1829_v24  ;;  %164 = vmatprep.subr.mxu0 %v1829_v24 }
  0x26   :  { %v255_v39 = vand.u32 4294901760, %v254_v32  ;;  %1682 = vrcp.f32 %v102_v30  ;;  %v261_v45 = vand.u32 4294901760, %v260_v33  ;;  %v267_v46 = vand.u32 4294901760, %v266_v34  ;;  %p1742_p0 = pnand %p1741_p13, %p1735_p10 }
  0x27   :  { %v273_v47 = vand.u32 4294901760, %v272_v35  ;;  %v279_v49 = vand.u32 4294901760, %v278_v36  ;;  %v2606_v50 = vand.u32 4294901760, %v1859_v40  ;;  %v2605_v51 = vand.u32 4294901760, %v1862_v41 }
  0x28   :  { %256 = vmatprep.subr.mxu1 %v255_v39  ;;  %v1867_v52 = vand.u32 4294901760, %v71_v37  ;;  %v1869_v53 = vand.u32 4294901760, %v68_v38  ;;  %v1871_v54 = vand.u32 4294901760, %v67_v42  ;;  %v1873_v55 = vand.u32 4294901760, %v64_v43  ;;  %v55_v39 = vld [vmem:[#allocation2 + $0x80] sm:$0xff] }
  0x29   :  { %262 = vmatpush1.msra.mxu1 %v261_v45  ;;  %v1875_v56 = vand.u32 4294901760, %v63_v44  ;;  %v284_v57 = vsub.f32 %v1859_v40, %v2606_v50  ;;  %v290_v58 = vsub.f32 %v1862_v41, %v2605_v51  ;;  %v1886_v60 = vand.u32 4294901760, %v60_v48 }
  0x2a   :  { %268 = vmatprep.subr.mxu1 %v267_v46  ;;  %v1884_v59 = vsub.f32 %v71_v37, %v1867_v52  ;;  %166 = vmatpush1.msra.mxu0 %v1867_v52  ;;  %v1890_v61 = vsub.f32 %v68_v38, %v1869_v53  ;;  %v1893_v62 = vsub.f32 %v67_v42, %v1871_v54  ;;  %v1915_v33 = vand.u32 4294901760, %v59_v2  ;;  %v52_v46 = vld [vmem:[#allocation2 + $0x68] sm:$0xff] }
  0x2b   :  { %274 = vmatpush1.msra.mxu1 %v273_v47  ;;  %v1896_v63 = vsub.f32 %v64_v43, %v1873_v55  ;;  %v1899_v1 = vsub.f32 %v63_v44, %v1875_v56  ;;  %v285_v6 = vand.u32 4294901760, %v284_v57  ;;  %v291_v7 = vand.u32 4294901760, %v290_v58  ;;  %168 = vmatprep.subr.mxu0 %v1869_v53  ;;  %v51_v47 = vld [vmem:[#allocation2 + $0x60] sm:$0xff] }
  0x2c   :  { %280 = vmatprep.subr.mxu1 %v279_v49  ;;  %v2601_v8 = vand.u32 4294901760, %v1884_v59  ;;  %v1903_v12 = vsub.f32 %v60_v48, %v1886_v60  ;;  %v2598_v13 = vand.u32 4294901760, %v1890_v61  ;;  %v2597_v21 = vand.u32 4294901760, %v1893_v62  ;;  %170 = vmatpush1.msra.mxu0 %v1871_v54  ;;  %v48_v48 = vld [vmem:[#allocation2 + $0x48] sm:$0xff] }
  0x2d   :  { %v2596_v22 = vand.u32 4294901760, %v1896_v63  ;;  %v2595_v29 = vand.u32 4294901760, %v1899_v1  ;;  %286 = vmatpush1.msra.mxu1 %v285_v6  ;;  %v1917_v34 = vand.u32 4294901760, %v56_v5  ;;  %172 = vmatprep.subr.mxu0 %v1873_v55  ;;  %v1936_v44 = vsub.f32 %v59_v2, %v1915_v33 }
  0x2e   :  { %v296_v30 = vsub.f32 %v1884_v59, %v2601_v8  ;;  %v2594_v32 = vand.u32 4294901760, %v1903_v12  ;;  %292 = vmatprep.subr.mxu1 %v291_v7  ;;  %v302_v35 = vsub.f32 %v1890_v61, %v2598_v13  ;;  %v308_v36 = vsub.f32 %v1893_v62, %v2597_v21  ;;  %174 = vmatpush1.msra.mxu0 %v1875_v56 }
  0x2f   :  { %v314_v37 = vsub.f32 %v1896_v63, %v2596_v22  ;;  %v320_v38 = vsub.f32 %v1899_v1, %v2595_v29  ;;  %v1939_v45 = vsub.f32 %v56_v5, %v1917_v34  ;;  %v100_v49 = vsub.f32 0.0, %v1839_v31  ;;  %176 = vmatprep.subr.mxu0 %v1886_v60 }
  0x30   :  { %v297_v42 = vand.u32 4294901760, %v296_v30  ;;  %v326_v43 = vsub.f32 %v1903_v12, %v2594_v32  ;;  %v303_v57 = vand.u32 4294901760, %v302_v35  ;;  %v309_v58 = vand.u32 4294901760, %v308_v36  ;;  %178 = vmatpush1.msra.mxu0 %v1915_v33 }
  0x31   :  { %v315_v6 = vand.u32 4294901760, %v314_v37  ;;  %v321_v7 = vand.u32 4294901760, %v320_v38  ;;  %v2600_v2 = vand.u32 4294901760, %v1936_v44  ;;  %v2599_v30 = vand.u32 4294901760, %v1939_v45  ;;  %180 = vmatprep.subr.mxu0 %v1917_v34 }
  0x32   :  { %298 = vmatpush1.msra.mxu1 %v297_v42  ;;  %v1946_v5 = vand.u32 4294901760, %v55_v39  ;;  %v1681_v32 = vpop.eup %1680  ;;  %v327_v29 = vand.u32 4294901760, %v326_v43  ;;  %v1949_v22 = vand.u32 4294901760, %v52_v46  ;;  %v1951_v31 = vand.u32 4294901760, %v51_v47 }
  0x33   :  { %304 = vmatprep.subr.mxu1 %v303_v57  ;;  %v1953_v35 = vand.u32 4294901760, %v48_v48  ;;  %v1683_v36 = vpop.eup %1682  ;;  %v98_v37 = vmul.f32 0.6931472, %v1681_v32  ;;  %v332_v38 = vsub.f32 %v1936_v44, %v2600_v2  ;;  %v338_v42 = vsub.f32 %v1939_v45, %v2599_v30  ;;  %v47_v57 = vld [vmem:[#allocation2 + $0x40] sm:$0xff] }
  0x34   :  { %310 = vmatpush1.msra.mxu1 %v309_v58  ;;  %v1963_v43 = vsub.f32 %v55_v39, %v1946_v5  ;;  %182 = vmatpush1.msra.mxu0 %v1946_v5  ;;  %v104_v21 = vmul.f32 %v1683_v36, %v100_v49  ;;  %v1967_v13 = vsub.f32 %v52_v46, %v1949_v22  ;;  %v44_v58 = vld [vmem:[#allocation2 + $0x28] sm:$0xff]  ;;  %v43_v36 = vld [vmem:[#allocation2 + $0x20] sm:$0xff]  ;;  %v2012_v50 = vand.u32 4294901760, %v40_v0 }
  0x35   :  { %316 = vmatprep.subr.mxu1 %v315_v6  ;;  %v1970_v32 = vsub.f32 %v51_v47, %v1951_v31  ;;  %184 = vmatprep.subr.mxu0 %v1949_v22  ;;  %v333_v30 = vand.u32 4294901760, %v332_v38  ;;  %v339_v39 = vand.u32 4294901760, %v338_v42  ;;  %v1976_v8 = vsub.f32 %v48_v48, %v1953_v35  ;;  %v39_v38 = vld [vmem:[#allocation2] sm:$0xff] }
  0x36   :  { %107 = vrot.lane.b32.xlu0 %v98_v37, %s1762_s13  ;;  %322 = vmatpush1.msra.mxu1 %v321_v7  ;;  %v2602_v2 = vand.u32 4294901760, %v1963_v43  ;;  %v105_v46 = vsel %vm89_vm0, %v104_v21, -100000.0  ;;  %v2603_v47 = vand.u32 4294901760, %v1967_v13  ;;  %v1982_v6 = vand.u32 4294901760, %v47_v57 }
  0x37   :  { %328 = vmatprep.subr.mxu1 %v327_v29  ;;  %v2604_v49 = vand.u32 4294901760, %v1970_v32  ;;  %186 = vmatpush1.msra.mxu0 %v1951_v31  ;;  %v2608_v48 = vand.u32 4294901760, %v1976_v8  ;;  %v1989_v37 = vand.u32 4294901760, %v44_v58  ;;  %v92_v27 = vmul.f32 0.2, %v1805_v14 }
  0x38   :  { %334 = vmatpush1.msra.mxu1 %v333_v30  ;;  %v344_v7 = vsub.f32 %v1963_v43, %v2602_v2  ;;  %188 = vmatprep.subr.mxu0 %v1953_v35  ;;  %v350_v21 = vsub.f32 %v1967_v13, %v2603_v47  ;;  %v1999_v30 = vsub.f32 %v47_v57, %v1982_v6  ;;  %v2008_v47 = vand.u32 4294901760, %v43_v36 }
  0x39   :  { %340 = vmatprep.subr.mxu1 %v339_v39  ;;  %v356_v29 = vsub.f32 %v1970_v32, %v2604_v49  ;;  %190 = vmatpush1.msra.mxu0 %v1982_v6  ;;  %v362_v39 = vsub.f32 %v1976_v8, %v2608_v48  ;;  %v2006_v2 = vsub.f32 %v44_v58, %v1989_v37  ;;  %v2018_v48 = vand.u32 4294901760, %v39_v38 }
  0x3a   :  { %111 = vrot.lane.b32.xlu0 %v105_v46, %s1764_s0  ;;  %v345_v42 = vand.u32 4294901760, %v344_v7  ;;  %192 = vmatprep.subr.mxu0 %v1989_v37  ;;  %v351_v49 = vand.u32 4294901760, %v350_v21  ;;  %v2609_v51 = vand.u32 4294901760, %v1999_v30  ;;  %v2016_v28 = vsub.f32 %v43_v36, %v2008_v47 }
  0x3b   :  { %v357_v57 = vand.u32 4294901760, %v356_v29  ;;  %v363_v46 = vand.u32 4294901760, %v362_v39  ;;  %v2610_v7 = vand.u32 4294901760, %v2006_v2  ;;  %194 = vmatpush1.msra.mxu0 %v2008_v47  ;;  %v2025_v21 = vsub.f32 %v40_v0, %v2012_v50 }
  0x3c   :  { %346 = vmatpush1.msra.mxu1 %v345_v42  ;;  %v368_v58 = vsub.f32 %v1999_v30, %v2609_v51  ;;  %196 = vmatprep.subr.mxu0 %v2012_v50  ;;  %v2611_v29 = vand.u32 4294901760, %v2016_v28  ;;  %v2033_v42 = vsub.f32 %v39_v38, %v2018_v48  ;;  %1684 = vlog2.f32 %v92_v27  ;;  %v86_v27 = vld [vmem:[#allocation2 + $0x178] sm:$0xff] }
  0x3d   :  { %352 = vmatprep.subr.mxu1 %v351_v49  ;;  %v374_v36 = vsub.f32 %v2006_v2, %v2610_v7  ;;  %v2621_v49 = vmov 0.0   ;;  %v2615_v0 = vand.u32 4294901760, %v2025_v21  ;;  %198 = vmatpush1.msra.mxu0 %v2018_v48 }
  0x3e   :  { %358 = vmatpush1.msra.mxu1 %v357_v57  ;;  %427 = vmatprep.mubr.f32.mxu1 %v2621_v49  ;;  %v369_v39 = vand.u32 4294901760, %v368_v58  ;;  %v380_v57 = vsub.f32 %v2016_v28, %v2611_v29  ;;  %v2616_v7 = vand.u32 4294901760, %v2033_v42 }
  0x3f   :  { %364 = vmatprep.subr.mxu1 %v363_v46  ;;  %v375_v51 = vand.u32 4294901760, %v374_v36  ;;  %231 = vmatprep.mubr.f32.mxu0 %v2621_v49  ;;  %v386_v38 = vsub.f32 %v2025_v21, %v2615_v0 }
  0x40   :  { %445 = vmatprep.subr.mxu0 %v1808_v15  ;;  %370 = vmatpush1.msra.mxu1 %v369_v39  ;;  %v381_v46 = vand.u32 4294901760, %v380_v57  ;;  %v392_v58 = vsub.f32 %v2033_v42, %v2616_v7  ;;  %v2642_v15 = vand.u32 4294901760, %v1815_v17 }
  0x41   :  { %376 = vmatprep.subr.mxu1 %v375_v51  ;;  %v387_v36 = vand.u32 4294901760, %v386_v38 }
  0x42   :  { %382 = vmatpush1.msra.mxu1 %v381_v46  ;;  %v393_v29 = vand.u32 4294901760, %v392_v58  ;;  %v78_v58 = vld [vmem:[#allocation2 + $0x138] sm:$0xff] }
  0x43   :  { %388 = vmatprep.subr.mxu1 %v387_v36  ;;  %v77_v36 = vld [vmem:[#allocation2 + $0x130] sm:$0xff] }
  0x44   :  { %394 = vmatpush1.msra.mxu1 %v393_v29  ;;  %v82_v29 = vld [vmem:[#allocation2 + $0x158] sm:$0xff] }
  0x45   :  { %565 = vmatprep.subr.mxu1 %v1792_v3 }
  0x49   :  { %v1685_v39 = vpop.eup %1684 }
  0x4a   :  { %v94_v25 = vmul.f32 0.6931472, %v1685_v39  ;;  %v74_v39 = vld [vmem:[#allocation2 + $0x118] sm:$0xff] }
  0xa8   :  { %v108_v26 = vpop.permute.xlu0 %107 }
  0xa9   :  { %v115_v51 = vsel %vm114_vm1, %v94_v25, %v108_v26 }
  0xac   :  { %v112_v57 = vpop.permute.xlu0 %111 }
  0xad   :  { %v117_v0 = vsel %vm116_vm2, %v115_v51, %v112_v57  ;;  %v2142_v51 = vand.u32 4294901760, %v77_v36  ;;  %v73_v57 = vld [vmem:[#allocation2 + $0x110] sm:$0xff] }
  0xae   :  { %v141_v7 = vsel %vm139_vm3, %v117_v0, 0  ;;  %v2115_v0 = vand.u32 4294901760, %v86_v27 }
  0xaf   :  { %v2052_v38 = vand.u32 4294901760, %v141_v7 }
  0xb1   :  { %v2055_v46 = vsub.f32 %v141_v7, %v2052_v38  ;;  %429 = vmatmul.mubr.f32.vlgmr.msra.gmra.mxu1 %v2052_v38  ;;  %v85_v7 = vld [vmem:[#allocation2 + $0x170] sm:$0xff] }
  0xb2   :  { %567 = vmatpush1.msra.mxu1 %v1794_v4  ;;  %644 = vmatprep.mubr.f32.mxu1 %v2621_v49 }
  0xb3   :  { %2639 = vst [vmem:[#allocation11_spill] sm:$0xff] %v2055_v46  ;;  %569 = vmatprep.subr.mxu1 %v1799_v9  ;;  %v2062_v14 = vand.u32 4294901760, %v2055_v46 }
  0xb4   :  { %571 = vmatpush1.msra.mxu1 %v1801_v10 }
  0xb5   :  { %2640 = vst [vmem:[#allocation12_spill] sm:$0xff] %v2062_v14  ;;  %573 = vmatprep.subr.mxu1 %v1803_v11  ;;  %v235_v25 = vsub.f32 %v2055_v46, %v2062_v14 }
  0xb6   :  { %575 = vmatpush1.msra.mxu1 %v1823_v20 }
  0xb7   :  { %577 = vmatprep.subr.mxu1 %v1829_v24  ;;  %v2070_v26 = vand.u32 4294901760, %v235_v25 }
  0xb8   :  { %579 = vmatpush1.msra.mxu1 %v1867_v52 }
  0xb9   :  { %581 = vmatprep.subr.mxu1 %v1869_v53  ;;  %237 = vmatmul.mubr.f32.vlgmr.msra.gmra.mxu0 %v2070_v26 }
  0xba   :  { %448 = vmatpush1.msra.mxu0 %v1811_v16  ;;  %583 = vmatpush1.msra.mxu1 %v1871_v54 }
  0xbb   :  { %451 = vmatprep.subr.mxu0 %v1815_v17  ;;  %585 = vmatprep.subr.mxu1 %v1873_v55  ;;  %v2644_v17 = vand.u32 4294901760, %v1821_v19 }
  0xbc   :  { %454 = vmatpush1.msra.mxu0 %v1818_v18  ;;  %587 = vmatpush1.msra.mxu1 %v1875_v56 }
  0xbd   :  { %457 = vmatprep.subr.mxu0 %v1821_v19  ;;  %589 = vmatprep.subr.mxu1 %v1886_v60  ;;  %v2648_v19 = vand.u32 4294901760, %v1862_v41 }
  0xbe   :  { %460 = vmatpush1.msra.mxu0 %v1859_v40  ;;  %591 = vmatpush1.msra.mxu1 %v1915_v33 }
  0xbf   :  { %463 = vmatprep.subr.mxu0 %v1862_v41  ;;  %593 = vmatprep.subr.mxu1 %v1917_v34 }
  0xc0   :  { %466 = vmatpush1.msra.mxu0 %v1884_v59  ;;  %595 = vmatpush1.msra.mxu1 %v1946_v5 }
  0xc1   :  { %469 = vmatprep.subr.mxu0 %v1890_v61  ;;  %597 = vmatprep.subr.mxu1 %v1949_v22 }
  0xc2   :  { %472 = vmatpush1.msra.mxu0 %v1893_v62  ;;  %599 = vmatpush1.msra.mxu1 %v1951_v31 }
  0xc3   :  { %475 = vmatprep.subr.mxu0 %v1896_v63  ;;  %601 = vmatprep.subr.mxu1 %v1953_v35 }
  0xc4   :  { %478 = vmatpush1.msra.mxu0 %v1899_v1  ;;  %603 = vmatpush1.msra.mxu1 %v1982_v6 }
  0xc5   :  { %481 = vmatprep.subr.mxu0 %v1903_v12  ;;  %605 = vmatprep.subr.mxu1 %v1989_v37 }
  0xc6   :  { %484 = vmatpush1.msra.mxu0 %v1936_v44  ;;  %607 = vmatpush1.msra.mxu1 %v2008_v47 }
  0xc7   :  { %487 = vmatprep.subr.mxu0 %v1939_v45  ;;  %609 = vmatprep.subr.mxu1 %v2012_v50 }
  0xc8   :  { %490 = vmatpush1.msra.mxu0 %v1963_v43  ;;  %611 = vmatpush1.msra.mxu1 %v2018_v48 }
  0xc9   :  { %493 = vmatprep.subr.mxu0 %v1967_v13  ;;  %648 = vmatmul.mubr.f32.vlgmr.msra.gmra.mxu1 %v2062_v14 }
  0xca   :  { %807 = vmatprep.subr.mxu1 %v1792_v3  ;;  %496 = vmatpush1.msra.mxu0 %v1970_v32  ;;  %v81_v3 = vld [vmem:[#allocation2 + $0x150] sm:$0xff] }
  0xcb   :  { %809 = vmatpush1.msra.mxu1 %v1794_v4  ;;  %499 = vmatprep.subr.mxu0 %v1976_v8  ;;  %v2119_v4 = vand.u32 4294901760, %v85_v7 }
  0xcc   :  { %811 = vmatprep.subr.mxu1 %v1799_v9  ;;  %502 = vmatpush1.msra.mxu0 %v1999_v30  ;;  %v2123_v9 = vand.u32 4294901760, %v82_v29 }
  0xcd   :  { %813 = vmatpush1.msra.mxu1 %v1801_v10  ;;  %505 = vmatprep.subr.mxu0 %v2006_v2  ;;  %v2127_v10 = vand.u32 4294901760, %v81_v3 }
  0xce   :  { %815 = vmatprep.subr.mxu1 %v1803_v11  ;;  %508 = vmatpush1.msra.mxu0 %v2016_v28  ;;  %v2132_v11 = vsub.f32 %v86_v27, %v2115_v0  ;;  %v2148_v25 = vsub.f32 %v82_v29, %v2123_v9  ;;  %v2150_v27 = vand.u32 4294901760, %v74_v39  ;;  %v2165_v29 = vand.u32 4294901760, %v73_v57 }
  0xcf   :  { %817 = vmatpush1.msra.mxu1 %v1823_v20  ;;  %511 = vmatprep.subr.mxu0 %v2025_v21  ;;  %v2134_v20 = vand.u32 4294901760, %v78_v58 }
  0xd0   :  { %819 = vmatprep.subr.mxu1 %v1829_v24  ;;  %514 = vmatpush1.msra.mxu0 %v2033_v42  ;;  %v2140_v24 = vsub.f32 %v85_v7, %v2119_v4  ;;  %v2197_v41 = vsub.f32 %v73_v57, %v2165_v29  ;;  %v2652_v57 = vand.u32 4294901760, %v1893_v62 }
  0xd1   :  { %547 = vmatprep.mubr.f32.mxu0 %v2621_v49  ;;  %821 = vmatpush1.msra.mxu1 %v1867_v52  ;;  %v2641_v52 = vand.u32 4294901760, %v1811_v16  ;;  %v2619_v16 = vand.u32 4294901760, %v2132_v11  ;;  %v2163_v7 = vsub.f32 %v78_v58, %v2134_v20  ;;  %v2179_v58 = vsub.f32 %v74_v39, %v2150_v27  ;;  %v65_v39 = vld [vmem:[#allocation2 + $0xd0] sm:$0xff] }
  0xd2   :  { %550 = vmatmul.mubr.f32.vlgmr.msra.gmra.mxu0 %v2055_v46  ;;  %665 = vmatprep.subr.mxu0 %v253_v23  ;;  %v2156_v23 = vsub.f32 %v81_v3, %v2127_v10  ;;  %v2618_v3 = vand.u32 4294901760, %v2148_v25  ;;  %2650 = vst [vmem:[#allocation15_spill] sm:$0xff] %v2197_v41  ;;  %v2656_v49 = vand.u32 4294901760, %v1903_v12  ;;  %v2661_v46 = vmov 0.0  }
  0xd3   :  { %823 = vmatprep.subr.mxu1 %v1869_v53  ;;  %669 = vmatpush1.msra.mxu0 %v2641_v52  ;;  %v2643_v53 = vand.u32 4294901760, %v1818_v18  ;;  %v70_v52 = vld [vmem:[#allocation2 + $0xf8] sm:$0xff]  ;;  %v2646_v18 = vand.u32 4294901760, %v1859_v40  ;;  %2647 = vst [vmem:[#allocation14_spill] sm:$0xff] %v2179_v58  ;;  %v2649_v40 = vand.u32 4294901760, %v1884_v59 }
  0xd4   :  { %825 = vmatpush1.msra.mxu1 %v1871_v54  ;;  %673 = vmatprep.subr.mxu0 %v2642_v15  ;;  %v2617_v54 = vand.u32 4294901760, %v2140_v24  ;;  %v69_v15 = vld [vmem:[#allocation2 + $0xf0] sm:$0xff] }
  0xd5   :  { %827 = vmatprep.subr.mxu1 %v1873_v55  ;;  %677 = vmatpush1.msra.mxu0 %v2643_v53  ;;  %v2172_v55 = vsub.f32 %v77_v36, %v2142_v51  ;;  %v2185_v36 = vand.u32 4294901760, %v70_v52  ;;  %v66_v53 = vld [vmem:[#allocation2 + $0xd8] sm:$0xff] }
  0xd6   :  { %829 = vmatpush1.msra.mxu1 %v1875_v56  ;;  %681 = vmatprep.subr.mxu0 %v2644_v17  ;;  %v2620_v56 = vand.u32 4294901760, %v2156_v23  ;;  %v2651_v17 = vand.u32 4294901760, %v1890_v61  ;;  %v2205_v59 = vsub.f32 %v2140_v24, %v2617_v54  ;;  %v2216_v61 = vsub.f32 %v2148_v25, %v2618_v3  ;;  %v58_v3 = vld [vmem:[#allocation2 + $0x98] sm:$0xff] }
  0xd7   :  { %2645 = vst [vmem:[#allocation13_spill] sm:$0xff] %v2172_v55  ;;  %831 = vmatprep.subr.mxu1 %v1886_v60  ;;  %685 = vmatpush1.msra.mxu0 %v2646_v18  ;;  %v2193_v60 = vsub.f32 %v2132_v11, %v2619_v16  ;;  %v2208_v18 = vand.u32 4294901760, %v69_v15  ;;  %v2653_v54 = vand.u32 4294901760, %v1896_v63  ;;  %v2655_v16 = vand.u32 4294901760, %v1899_v1 }
  0xd8   :  { %833 = vmatpush1.msra.mxu1 %v1915_v33  ;;  %689 = vmatprep.subr.mxu0 %v2648_v19  ;;  %v2623_v33 = vand.u32 4294901760, %v2163_v7  ;;  %v62_v19 = vld [vmem:[#allocation2 + $0xb8] sm:$0xff]  ;;  %v2227_v62 = vsub.f32 %v2156_v23, %v2620_v56  ;;  %v1012_v1 = vand.u32 4294901760, %v2205_v59  ;;  %v1018_v12 = vand.u32 4294901760, %v2216_v61  ;;  %v49_v61 = vld [vmem:[#allocation2 + $0x50] sm:$0xff] }
  0xd9   :  { %835 = vmatprep.subr.mxu1 %v1917_v34  ;;  %693 = vmatpush1.msra.mxu0 %v2649_v40  ;;  %v2624_v34 = vand.u32 4294901760, %v2172_v55  ;;  %v2219_v40 = vand.u32 4294901760, %v66_v53  ;;  %v2244_v56 = vand.u32 4294901760, %v62_v19 }
  0xda   :  { %837 = vmatpush1.msra.mxu1 %v1946_v5  ;;  %697 = vmatprep.subr.mxu0 %v2651_v17  ;;  %v2625_v5 = vand.u32 4294901760, %v2179_v58  ;;  %v61_v17 = vld [vmem:[#allocation2 + $0xb0] sm:$0xff]  ;;  %v2241_v63 = vsub.f32 %v2163_v7, %v2623_v33  ;;  %v54_v33 = vld [vmem:[#allocation2 + $0x78] sm:$0xff] }
  0xdb   :  { %839 = vmatprep.subr.mxu1 %v1949_v22  ;;  %701 = vmatpush1.msra.mxu0 %v2652_v57  ;;  %v2230_v22 = vsub.f32 %v70_v52, %v2185_v36  ;;  %v2232_v57 = vand.u32 4294901760, %v65_v39  ;;  %v57_v52 = vld [vmem:[#allocation2 + $0x90] sm:$0xff]  ;;  %v2270_v59 = vsub.f32 %v66_v53, %v2219_v40  ;;  %v2659_v53 = vand.u32 4294901760, %v1963_v43 }
  0xdc   :  { %841 = vmatpush1.msra.mxu1 %v1951_v31  ;;  %705 = vmatprep.subr.mxu0 %v2653_v54  ;;  %v1006_v31 = vand.u32 4294901760, %v2193_v60  ;;  %v2258_v60 = vand.u32 4294901760, %v61_v17  ;;  %v50_v54 = vld [vmem:[#allocation2 + $0x58] sm:$0xff]  ;;  %v45_v43 = vld [vmem:[#allocation2 + $0x30] sm:$0xff] }
  0xdd   :  { %2654 = vst [vmem:[#allocation16_spill] sm:$0xff] %v2230_v22  ;;  %843 = vmatprep.subr.mxu1 %v1953_v35  ;;  %709 = vmatpush1.msra.mxu0 %v2655_v16  ;;  %v2253_v35 = vsub.f32 %v2172_v55, %v2624_v34  ;;  %v2256_v16 = vsub.f32 %v69_v15, %v2208_v18  ;;  %v2272_v15 = vand.u32 4294901760, %v58_v3  ;;  %v53_v34 = vld [vmem:[#allocation2 + $0x70] sm:$0xff]  ;;  %v2665_v55 = vand.u32 4294901760, %v1976_v8 }
  0xde   :  { %845 = vmatpush1.msra.mxu1 %v1982_v6  ;;  %713 = vmatprep.subr.mxu0 %v2656_v49  ;;  %v2657_v6 = vand.u32 4294901760, %v1936_v44  ;;  %v2267_v49 = vsub.f32 %v2179_v58, %v2625_v5  ;;  %v1024_v44 = vand.u32 4294901760, %v2227_v62  ;;  %v2282_v5 = vand.u32 4294901760, %v57_v52 }
  0xdf   :  { %847 = vmatprep.subr.mxu1 %v1989_v37  ;;  %v2658_v37 = vand.u32 4294901760, %v1939_v45  ;;  %v2660_v45 = vand.u32 4294901760, %v2197_v41  ;;  %v2294_v62 = vsub.f32 %v62_v19, %v2244_v56  ;;  %886 = vmatprep.mubr.f32.mxu1 %v2661_v46  ;;  %v2662_v19 = vand.u32 4294901760, %v1967_v13 }
  0xe0   :  { %717 = vmatpush1.msra.mxu0 %v2657_v6  ;;  %849 = vmatpush1.msra.mxu1 %v2008_v47  ;;  %v2280_v6 = vsub.f32 %v65_v39, %v2232_v57  ;;  %v1030_v47 = vand.u32 4294901760, %v2241_v63  ;;  %v2296_v39 = vand.u32 4294901760, %v54_v33  ;;  %v2303_v63 = vsub.f32 %v61_v17, %v2258_v60 }
  0xe1   :  { %721 = vmatprep.subr.mxu0 %v2658_v37  ;;  %851 = vmatprep.subr.mxu1 %v2012_v50  ;;  %v2291_v37 = vsub.f32 %v2197_v41, %v2660_v45  ;;  %v1036_v50 = vand.u32 4294901760, %v2253_v35  ;;  %v46_v45 = vld [vmem:[#allocation2 + $0x38] sm:$0xff]  ;;  %v1042_v14 = vand.u32 4294901760, %v2267_v49  ;;  %v2313_v41 = vsub.f32 %v58_v3, %v2272_v15 }
  0xe2   :  { %725 = vmatpush1.msra.mxu0 %v2659_v53  ;;  %853 = vmatpush1.msra.mxu1 %v2018_v48  ;;  %v2305_v53 = vand.u32 4294901760, %v53_v34  ;;  %v2315_v35 = vand.u32 4294901760, %v50_v54  ;;  %v2663_v17 = vand.u32 4294901760, %v1970_v32  ;;  %v2664_v58 = vand.u32 4294901760, %v2230_v22  ;;  %v42_v3 = vld [vmem:[#allocation2 + $0x18] sm:$0xff] }
  0xe3   :  { %729 = vmatprep.subr.mxu0 %v2662_v19  ;;  %888 = vmatmul.mubr.f32.vlgmr.msra.gmra.mxu1 %v2052_v38  ;;  %v2324_v49 = vsub.f32 %v57_v52, %v2282_v5  ;;  %v2326_v48 = vand.u32 4294901760, %v49_v61  ;;  %v41_v19 = vld [vmem:[#allocation2 + $0x10] sm:$0xff]  ;;  %v2666_v52 = vand.u32 4294901760, %v1999_v30 }
  0xe4   :  { %1007 = vmatprep.subr.mxu1 %v1006_v31  ;;  %733 = vmatpush1.msra.mxu0 %v2663_v17  ;;  %v1053_v13 = vsub.f32 %v2230_v22, %v2664_v58  ;;  %v1048_v31 = vand.u32 4294901760, %v2291_v37  ;;  %v2333_v17 = vsub.f32 %v54_v33, %v2296_v39  ;;  %v2335_v58 = vand.u32 4294901760, %v46_v45 }
  0xe5   :  { %1013 = vmatpush1.msra.mxu1 %v1012_v1  ;;  %737 = vmatprep.subr.mxu0 %v2665_v55  ;;  %v2667_v22 = vand.u32 4294901760, %v2256_v16  ;;  %v2344_v55 = vsub.f32 %v53_v34, %v2305_v53  ;;  %v2346_v37 = vand.u32 4294901760, %v45_v43  ;;  %v2668_v33 = vand.u32 4294901760, %v2006_v2 }
  0xe6   :  { %1019 = vmatprep.subr.mxu1 %v1018_v12  ;;  %741 = vmatpush1.msra.mxu0 %v2666_v52  ;;  %v2669_v12 = vand.u32 4294901760, %v2270_v59  ;;  %v2355_v32 = vsub.f32 %v50_v54, %v2315_v35  ;;  %v2670_v34 = vand.u32 4294901760, %v2016_v28  ;;  %v2366_v8 = vsub.f32 %v49_v61, %v2326_v48 }
  0xe7   :  { %v1059_v1 = vsub.f32 %v2256_v16, %v2667_v22  ;;  %1025 = vmatpush1.msra.mxu1 %v1024_v44  ;;  %745 = vmatprep.subr.mxu0 %v2668_v33  ;;  %v2357_v22 = vand.u32 4294901760, %v42_v3  ;;  %v2671_v44 = vand.u32 4294901760, %v2280_v6  ;;  %v2672_v54 = vand.u32 4294901760, %v2025_v21 }
  0xe8   :  { %v1065_v30 = vsub.f32 %v2270_v59, %v2669_v12  ;;  %1031 = vmatprep.subr.mxu1 %v1030_v47  ;;  %749 = vmatpush1.msra.mxu0 %v2670_v34  ;;  %v2368_v12 = vand.u32 4294901760, %v41_v19  ;;  %v1054_v52 = vand.u32 4294901760, %v1053_v13  ;;  %v2673_v47 = vand.u32 4294901760, %v2294_v62 }
  0xe9   :  { %v1071_v2 = vsub.f32 %v2280_v6, %v2671_v44  ;;  %1037 = vmatpush1.msra.mxu1 %v1036_v50  ;;  %753 = vmatprep.subr.mxu0 %v2672_v54  ;;  %v2636_v34 = vand.u32 4294901760, %v2333_v17  ;;  %v2377_v44 = vsub.f32 %v46_v45, %v2335_v58  ;;  %v2674_v61 = vand.u32 4294901760, %v2033_v42 }
  0xea   :  { %v1077_v28 = vsub.f32 %v2294_v62, %v2673_v47  ;;  %1043 = vmatprep.subr.mxu1 %v1042_v14  ;;  %v1060_v33 = vand.u32 4294901760, %v1059_v1  ;;  %v2675_v50 = vand.u32 4294901760, %v2303_v63  ;;  %v2637_v13 = vand.u32 4294901760, %v2344_v55  ;;  %790 = vmatprep.mubr.f32.mxu0 %v2661_v46 }
  0xeb   :  { %757 = vmatpush1.msra.mxu0 %v2674_v61  ;;  %v2386_v54 = vsub.f32 %v45_v43, %v2346_v37  ;;  %1049 = vmatpush1.msra.mxu1 %v1048_v31  ;;  %v1066_v47 = vand.u32 4294901760, %v1065_v30  ;;  %v2676_v45 = vand.u32 4294901760, %v2313_v41  ;;  %v2394_v1 = vsub.f32 %v42_v3, %v2357_v22 }
  0xec   :  { %v1083_v21 = vsub.f32 %v2303_v63, %v2675_v50  ;;  %792 = vmatmul.mubr.f32.vlgmr.msra.gmra.mxu0 %v2052_v38  ;;  %903 = vmatprep.subr.mxu0 %v2115_v0  ;;  %v1072_v61 = vand.u32 4294901760, %v1071_v2  ;;  %v2677_v43 = vand.u32 4294901760, %v2324_v49  ;;  %v2638_v31 = vand.u32 4294901760, %v2366_v8 }
  0xed   :  { %v1089_v14 = vsub.f32 %v2313_v41, %v2676_v45  ;;  %v2403_v30 = vsub.f32 %v41_v19, %v2368_v12  ;;  %1055 = vmatprep.subr.mxu1 %v1054_v52  ;;  %905 = vmatpush1.msra.mxu0 %v2119_v4  ;;  %v1078_v45 = vand.u32 4294901760, %v1077_v28  ;;  %v1101_v3 = vsub.f32 %v2333_v17, %v2636_v34 }
  0xee   :  { %v1095_v50 = vsub.f32 %v2324_v49, %v2677_v43  ;;  %1061 = vmatpush1.msra.mxu1 %v1060_v33  ;;  %907 = vmatprep.subr.mxu0 %v2123_v9  ;;  %v1084_v2 = vand.u32 4294901760, %v1083_v21  ;;  %v1107_v43 = vsub.f32 %v2344_v55, %v2637_v13  ;;  %v1130_v19 = vand.u32 4294901760, %v2386_v54 }
  0xef   :  { %1067 = vmatprep.subr.mxu1 %v1066_v47  ;;  %909 = vmatpush1.msra.mxu0 %v2127_v10  ;;  %v1090_v52 = vand.u32 4294901760, %v1089_v14  ;;  %v2678_v28 = vand.u32 4294901760, %v2355_v32  ;;  %v1136_v42 = vand.u32 4294901760, %v2394_v1  ;;  %v1119_v21 = vsub.f32 %v2366_v8, %v2638_v31 }
  0xf0   :  { %1073 = vmatpush1.msra.mxu1 %v1072_v61  ;;  %911 = vmatprep.subr.mxu0 %v2134_v20  ;;  %v1096_v33 = vand.u32 4294901760, %v1095_v50  ;;  %v1142_v13 = vand.u32 4294901760, %v2403_v30  ;;  %v1102_v47 = vand.u32 4294901760, %v1101_v3  ;;  %v2679_v14 = vand.u32 4294901760, %v2377_v44 }
  0xf1   :  { %v1113_v34 = vsub.f32 %v2355_v32, %v2678_v28  ;;  %1079 = vmatprep.subr.mxu1 %v1078_v45  ;;  %913 = vmatpush1.msra.mxu0 %v2142_v51  ;;  %v1108_v61 = vand.u32 4294901760, %v1107_v43  ;;  %v1131_v50 = vsub.f32 %v2386_v54, %v1130_v19  ;;  %v1137_v45 = vsub.f32 %v2394_v1, %v1136_v42 }
  0xf2   :  { %v1125_v28 = vsub.f32 %v2377_v44, %v2679_v14  ;;  %1085 = vmatpush1.msra.mxu1 %v1084_v2  ;;  %915 = vmatprep.subr.mxu0 %v2150_v27  ;;  %v1120_v3 = vand.u32 4294901760, %v1119_v21  ;;  %v1143_v2 = vsub.f32 %v2403_v30, %v1142_v13  ;;  %v2682_v21 = vld [vmem:[#allocation15_spill] sm:$0xff]  ;;  %v2684_v14 = vld [vmem:[#allocation12_spill] sm:$0xff] }
  0xf3   :  { %1091 = vmatprep.subr.mxu1 %v1090_v52  ;;  %917 = vmatpush1.msra.mxu0 %v2165_v29  ;;  %v1114_v31 = vand.u32 4294901760, %v1113_v34  ;;  %v1132_v34 = vand.u32 4294901760, %v1131_v50  ;;  %v1138_v52 = vand.u32 4294901760, %v1137_v45 }
  0xf4   :  { %1097 = vmatpush1.msra.mxu1 %v1096_v33  ;;  %919 = vmatprep.subr.mxu0 %v2185_v36  ;;  %v1126_v43 = vand.u32 4294901760, %v1125_v28  ;;  %v1144_v33 = vand.u32 4294901760, %v1143_v2 }
  0xf5   :  { %1103 = vmatprep.subr.mxu1 %v1102_v47  ;;  %921 = vmatpush1.msra.mxu0 %v2208_v18  ;;  %v2683_v47 = vld [vmem:[#allocation16_spill] sm:$0xff] }
  0xf6   :  { %1109 = vmatpush1.msra.mxu1 %v1108_v61  ;;  %923 = vmatprep.subr.mxu0 %v2219_v40 }
  0xf7   :  { %1115 = vmatprep.subr.mxu1 %v1114_v31  ;;  %925 = vmatpush1.msra.mxu0 %v2232_v57  ;;  %v2681_v31 = vld [vmem:[#allocation14_spill] sm:$0xff] }
  0xf8   :  { %1121 = vmatpush1.msra.mxu1 %v1120_v3  ;;  %927 = vmatprep.subr.mxu0 %v2244_v56 }
  0xf9   :  { %1127 = vmatprep.subr.mxu1 %v1126_v43  ;;  %929 = vmatpush1.msra.mxu0 %v2258_v60 }
  0xfa   :  { %1133 = vmatpush1.msra.mxu1 %v1132_v34  ;;  %931 = vmatprep.subr.mxu0 %v2272_v15 }
  0xfb   :  { %1139 = vmatprep.subr.mxu1 %v1138_v52  ;;  %933 = vmatpush1.msra.mxu0 %v2282_v5 }
  0xfc   :  { %1145 = vmatpush1.msra.mxu1 %v1144_v33  ;;  %1178 = vmatprep.mubr.f32.mxu1 %v2661_v46 }
  0xfd   :  { %935 = vmatprep.subr.mxu0 %v2296_v39  ;;  %1180 = vmatmul.mubr.f32.vlgmr.msra.gmra.mxu1 %v2052_v38 }
  0xfe   :  { %1316 = vmatprep.subr.mxu1 %v2115_v0  ;;  %937 = vmatpush1.msra.mxu0 %v2305_v53 }
  0xff   :  { %1318 = vmatpush1.msra.mxu1 %v2119_v4  ;;  %939 = vmatprep.subr.mxu0 %v2315_v35 }
 0x100   :  { %1320 = vmatprep.subr.mxu1 %v2123_v9  ;;  %941 = vmatpush1.msra.mxu0 %v2326_v48 }
 0x101   :  { %1322 = vmatpush1.msra.mxu1 %v2127_v10  ;;  %943 = vmatprep.subr.mxu0 %v2335_v58 }
 0x102   :  { %1324 = vmatprep.subr.mxu1 %v2134_v20  ;;  %945 = vmatpush1.msra.mxu0 %v2346_v37 }
 0x103   :  { %1326 = vmatpush1.msra.mxu1 %v2142_v51  ;;  %947 = vmatprep.subr.mxu0 %v2357_v22 }
 0x104   :  { %1328 = vmatprep.subr.mxu1 %v2150_v27  ;;  %949 = vmatpush1.msra.mxu0 %v2368_v12 }
 0x105   :  { %982 = vmatprep.mubr.f32.mxu0 %v2661_v46  ;;  %1330 = vmatpush1.msra.mxu1 %v2165_v29 }
 0x106   :  { %988 = vmatmul.mubr.f32.vlgmr.msra.gmra.mxu0 %v2070_v26  ;;  %1196 = vmatprep.subr.mxu0 %v2132_v11  ;;  %v2680_v26 = vld [vmem:[#allocation13_spill] sm:$0xff] }
 0x107   :  { %1332 = vmatprep.subr.mxu1 %v2185_v36  ;;  %1199 = vmatpush1.msra.mxu0 %v2140_v24 }
 0x108   :  { %1334 = vmatpush1.msra.mxu1 %v2208_v18  ;;  %1202 = vmatprep.subr.mxu0 %v2148_v25 }
 0x109   :  { %1336 = vmatprep.subr.mxu1 %v2219_v40  ;;  %1205 = vmatpush1.msra.mxu0 %v2156_v23 }
 0x10a   :  { %1338 = vmatpush1.msra.mxu1 %v2232_v57  ;;  %1208 = vmatprep.subr.mxu0 %v2163_v7 }
 0x10b   :  { %1340 = vmatprep.subr.mxu1 %v2244_v56  ;;  %1211 = vmatpush1.msra.mxu0 %v2680_v26 }
 0x10c   :  { %1342 = vmatpush1.msra.mxu1 %v2258_v60  ;;  %1214 = vmatprep.subr.mxu0 %v2681_v31 }
 0x10d   :  { %1344 = vmatprep.subr.mxu1 %v2272_v15  ;;  %1217 = vmatpush1.msra.mxu0 %v2682_v21 }
 0x10e   :  { %1346 = vmatpush1.msra.mxu1 %v2282_v5  ;;  %1220 = vmatprep.subr.mxu0 %v2683_v47 }
 0x10f   :  { %1348 = vmatprep.subr.mxu1 %v2296_v39  ;;  %1223 = vmatpush1.msra.mxu0 %v2256_v16 }
 0x110   :  { %1350 = vmatpush1.msra.mxu1 %v2305_v53  ;;  %1226 = vmatprep.subr.mxu0 %v2270_v59 }
 0x111   :  { %1352 = vmatprep.subr.mxu1 %v2315_v35  ;;  %1229 = vmatpush1.msra.mxu0 %v2280_v6 }
 0x112   :  { %1354 = vmatpush1.msra.mxu1 %v2326_v48  ;;  %1232 = vmatprep.subr.mxu0 %v2294_v62 }
 0x113   :  { %1356 = vmatprep.subr.mxu1 %v2335_v58  ;;  %1235 = vmatpush1.msra.mxu0 %v2303_v63 }
 0x114   :  { %1358 = vmatpush1.msra.mxu1 %v2346_v37  ;;  %1238 = vmatprep.subr.mxu0 %v2313_v41 }
 0x115   :  { %1360 = vmatprep.subr.mxu1 %v2357_v22  ;;  %1241 = vmatpush1.msra.mxu0 %v2324_v49 }
 0x116   :  { %1362 = vmatpush1.msra.mxu1 %v2368_v12  ;;  %1395 = vmatprep.mubr.f32.mxu1 %v2661_v46 }
 0x117   :  { %1244 = vmatprep.subr.mxu0 %v2333_v17  ;;  %1399 = vmatmul.mubr.f32.vlgmr.msra.gmra.mxu1 %v2684_v14 }
 0x118   :  { %1558 = vmatprep.subr.mxu1 %v2115_v0  ;;  %1247 = vmatpush1.msra.mxu0 %v2344_v55  ;;  %v2685_v0 = vld [vmem:[#allocation11_spill] sm:$0xff] }
 0x119   :  { %1560 = vmatpush1.msra.mxu1 %v2119_v4  ;;  %1250 = vmatprep.subr.mxu0 %v2355_v32  ;;  %v2686_v4 = vand.u32 4294901760, %v2132_v11  ;;  %v2690_v11 = vand.u32 4294901760, %v2163_v7  ;;  %v2696_v7 = vand.u32 4294901760, %v2270_v59 }
 0x11a   :  { %1562 = vmatprep.subr.mxu1 %v2123_v9  ;;  %1253 = vmatpush1.msra.mxu0 %v2366_v8  ;;  %v2687_v9 = vand.u32 4294901760, %v2140_v24  ;;  %v2691_v24 = vand.u32 4294901760, %v2680_v26 }
 0x11b   :  { %1564 = vmatpush1.msra.mxu1 %v2127_v10  ;;  %1256 = vmatprep.subr.mxu0 %v2377_v44  ;;  %v2688_v10 = vand.u32 4294901760, %v2148_v25  ;;  %v2693_v25 = vand.u32 4294901760, %v2682_v21 }
 0x11c   :  { %1566 = vmatprep.subr.mxu1 %v2134_v20  ;;  %1259 = vmatpush1.msra.mxu0 %v2386_v54  ;;  %v2689_v20 = vand.u32 4294901760, %v2156_v23  ;;  %v2695_v23 = vand.u32 4294901760, %v2256_v16  ;;  %v2705_v16 = vand.u32 4294901760, %v2366_v8 }
 0x11d   :  { %1568 = vmatpush1.msra.mxu1 %v2142_v51  ;;  %1262 = vmatprep.subr.mxu0 %v2394_v1  ;;  %v2692_v51 = vand.u32 4294901760, %v2681_v31 }
 0x11e   :  { %1570 = vmatprep.subr.mxu1 %v2150_v27  ;;  %1265 = vmatpush1.msra.mxu0 %v2403_v30  ;;  %v2694_v27 = vand.u32 4294901760, %v2683_v47 }
 0x11f   :  { %1298 = vmatprep.mubr.f32.mxu0 %v2661_v46  ;;  %1572 = vmatpush1.msra.mxu1 %v2165_v29  ;;  %v2697_v29 = vand.u32 4294901760, %v2280_v6  ;;  %v88_v6 = vld [vmem:[#allocation2 + $0x180] ss:$8 sm:$0xf] }
 0x120   :  { %1301 = vmatmul.mubr.f32.vlgmr.msra.gmra.mxu0 %v2685_v0  ;;  %1416 = vmatprep.subr.mxu0 %v2686_v4 }
 0x121   :  { %1574 = vmatprep.subr.mxu1 %v2185_v36  ;;  %1420 = vmatpush1.msra.mxu0 %v2687_v9  ;;  %v2699_v36 = vand.u32 4294901760, %v2303_v63 }
 0x122   :  { %1576 = vmatpush1.msra.mxu1 %v2208_v18  ;;  %1424 = vmatprep.subr.mxu0 %v2688_v10  ;;  %v2700_v18 = vand.u32 4294901760, %v2313_v41  ;;  %v2704_v41 = vand.u32 4294901760, %v2355_v32 }
 0x123   :  { %1578 = vmatprep.subr.mxu1 %v2219_v40  ;;  %1428 = vmatpush1.msra.mxu0 %v2689_v20  ;;  %v2702_v40 = vand.u32 4294901760, %v2333_v17 }
 0x124   :  { %1580 = vmatpush1.msra.mxu1 %v2232_v57  ;;  %1432 = vmatprep.subr.mxu0 %v2690_v11  ;;  %v2703_v57 = vand.u32 4294901760, %v2344_v55 }
 0x125   :  { %1582 = vmatprep.subr.mxu1 %v2244_v56  ;;  %1436 = vmatpush1.msra.mxu0 %v2691_v24  ;;  %v2698_v56 = vand.u32 4294901760, %v2294_v62 }
 0x126   :  { %1584 = vmatpush1.msra.mxu1 %v2258_v60  ;;  %1440 = vmatprep.subr.mxu0 %v2692_v51  ;;  %v2706_v60 = vand.u32 4294901760, %v2377_v44 }
 0x127   :  { %1586 = vmatprep.subr.mxu1 %v2272_v15  ;;  %1444 = vmatpush1.msra.mxu0 %v2693_v25 }
 0x128   :  { %1588 = vmatpush1.msra.mxu1 %v2282_v5  ;;  %1448 = vmatprep.subr.mxu0 %v2694_v27  ;;  %v2701_v5 = vand.u32 4294901760, %v2324_v49 }
 0x129   :  { %1590 = vmatprep.subr.mxu1 %v2296_v39  ;;  %1452 = vmatpush1.msra.mxu0 %v2695_v23 }
 0x12a   :  { %1592 = vmatpush1.msra.mxu1 %v2305_v53  ;;  %1456 = vmatprep.subr.mxu0 %v2696_v7 }
 0x12b   :  { %1594 = vmatprep.subr.mxu1 %v2315_v35  ;;  %1460 = vmatpush1.msra.mxu0 %v2697_v29 }
 0x12c   :  { %1596 = vmatpush1.msra.mxu1 %v2326_v48  ;;  %1464 = vmatprep.subr.mxu0 %v2698_v56 }
 0x12d   :  { %1598 = vmatprep.subr.mxu1 %v2335_v58  ;;  %1468 = vmatpush1.msra.mxu0 %v2699_v36 }
 0x12e   :  { %1600 = vmatpush1.msra.mxu1 %v2346_v37  ;;  %1472 = vmatprep.subr.mxu0 %v2700_v18 }
 0x12f   :  { %1602 = vmatprep.subr.mxu1 %v2357_v22  ;;  %1476 = vmatpush1.msra.mxu0 %v2701_v5 }
 0x130   :  { %1604 = vmatpush1.msra.mxu1 %v2368_v12  ;;  %1637 = vmatprep.mubr.f32.mxu1 %v2661_v46 }
 0x131   :  { %1480 = vmatprep.subr.mxu0 %v2702_v40  ;;  %1639 = vmatmul.mubr.f32.vlgmr.msra.gmra.mxu1 %v2052_v38 }
 0x132   :  { %1484 = vmatpush1.msra.mxu0 %v2703_v57  ;;  %1541 = vmatprep.mubr.f32.mxu0 %v2661_v46  ;;  %v119_v46 = vlaneseq }
 0x133   :  { %1488 = vmatprep.subr.mxu0 %v2704_v41 }
 0x134   :  { %1492 = vmatpush1.msra.mxu0 %v2705_v16  ;;  %v120_v59 = vshrl.u32 %v119_v46, 7 }
 0x135   :  { %1496 = vmatprep.subr.mxu0 %v2706_v60 }
 0x136   :  { %1500 = vmatpush1.msra.mxu0 %v1130_v19  ;;  %v121_v15 = vsub.s32 0, %v120_v59  ;;  %v125_v62 = vsub.s32 1, %v120_v59  ;;  %v129_v52 = vsub.s32 2, %v120_v59  ;;  %v133_v33 = vsub.s32 3, %v120_v59 }
 0x137   :  { %1504 = vmatprep.subr.mxu0 %v1136_v42 }
 0x138   :  { %1508 = vmatpush1.msra.mxu0 %v1142_v13  ;;  %v122_v63 = vrot.slane %v88_v6, %v121_v15  ;;  %v126_v53 = vrot.slane %v88_v6, %v125_v62  ;;  %v130_v31 = vrot.slane %v88_v6, %v129_v52  ;;  %v134_v21 = vrot.slane %v88_v6, %v133_v33 }
 0x139   :  { %1543 = vmatmul.mubr.f32.vlgmr.msra.gmra.mxu0 %v2052_v38 }
 0x171   :  { %v430_v48 = vpop.f32.mrf.mxu1 }
 0x173   :  { %v432_v58 = vpop.f32.mrf.mxu1 }
 0x179   :  { %v238_v39 = vpop.f32.mrf.mxu0 }
 0x17a   :  { %v239_v49 = vadd.f32 %v238_v39, %v122_v63 }
 0x17b   :  { %v240_v35 = vpop.f32.mrf.mxu0 }
 0x17c   :  { %v241_v17 = vadd.f32 %v240_v35, %v126_v53  ;;  %v431_v8 = vadd.f32 %v430_v48, %v239_v49 }
 0x17e   :  { %v433_v12 = vadd.f32 %v432_v58, %v241_v17 }
 0x189   :  { %v649_v55 = vpop.f32.mrf.mxu1 }
 0x18b   :  { %v651_v44 = vpop.f32.mrf.mxu1 }
 0x192   :  { %v551_v32 = vpop.f32.mrf.mxu0 }
 0x193   :  { %v552_v22 = vadd.f32 %v551_v32, %v431_v8 }
 0x194   :  { %v553_v37 = vpop.f32.mrf.mxu0 }
 0x195   :  { %v554_v38 = vadd.f32 %v553_v37, %v433_v12  ;;  %v650_v13 = vadd.f32 %v649_v55, %v552_v22 }
 0x197   :  { %v652_v30 = vadd.f32 %v651_v44, %v554_v38 }
 0x1a3   :  { %v889_v54 = vpop.f32.mrf.mxu1 }
 0x1a5   :  { %v891_v50 = vpop.f32.mrf.mxu1 }
 0x1ac   :  { %v793_v42 = vpop.f32.mrf.mxu0 }
 0x1ad   :  { %v794_v1 = vadd.f32 %v793_v42, %v650_v13 }
 0x1ae   :  { %v795_v19 = vpop.f32.mrf.mxu0 }
 0x1af   :  { %v890_v28 = vadd.f32 %v889_v54, %v794_v1  ;;  %v796_v61 = vadd.f32 %v795_v19, %v652_v30 }
 0x1b1   :  { %v1645_v45 = vmul.f32 1.442695, %v890_v28  ;;  %v892_v3 = vadd.f32 %v891_v50, %v796_v61 }
 0x1b3   :  { %1686 = vpow2.f32 %v1645_v45  ;;  %v1647_v2 = vmul.f32 1.442695, %v892_v3 }
 0x1b5   :  { %1688 = vpow2.f32 %v1647_v2 }
 0x1bd   :  { %v1181_v47 = vpop.f32.mrf.mxu1 }
 0x1bf   :  { %v1183_v10 = vpop.f32.mrf.mxu1 }
 0x1c0   :  { %v1687_v43 = vpop.eup %1686 }
 0x1c1   :  { %1653 = vst [vmem:[#allocation7] sm:$0xff] %v1687_v43 }
 0x1c2   :  { %v1689_v34 = vpop.eup %1688 }
 0x1c3   :  { %1654 = vst [vmem:[#allocation7 + $0x8] sm:$0xff] %v1689_v34 }
 0x1c6   :  { %v989_v26 = vpop.f32.mrf.mxu0 }
 0x1c7   :  { %v990_v0 = vadd.f32 %v989_v26, %v130_v31 }
 0x1c8   :  { %v991_v14 = vpop.f32.mrf.mxu0 }
 0x1c9   :  { %v992_v9 = vadd.f32 %v991_v14, %v134_v21  ;;  %v1182_v20 = vadd.f32 %v1181_v47, %v990_v0 }
 0x1cb   :  { %v1184_v25 = vadd.f32 %v1183_v10, %v992_v9 }
 0x1d7   :  { %v1400_v11 = vpop.f32.mrf.mxu1 }
 0x1d9   :  { %v1402_v23 = vpop.f32.mrf.mxu1 }
 0x1e0   :  { %v1302_v4 = vpop.f32.mrf.mxu0 }
 0x1e1   :  { %v1303_v51 = vadd.f32 %v1302_v4, %v1182_v20 }
 0x1e2   :  { %v1304_v24 = vpop.f32.mrf.mxu0 }
 0x1e3   :  { %v1305_v27 = vadd.f32 %v1304_v24, %v1184_v25  ;;  %v1401_v7 = vadd.f32 %v1400_v11, %v1303_v51 }
 0x1e5   :  { %v1403_v18 = vadd.f32 %v1402_v23, %v1305_v27 }
 0x1f1   :  { %v1640_v29 = vpop.f32.mrf.mxu1 }
 0x1f3   :  { %v1642_v41 = vpop.f32.mrf.mxu1 }
 0x1f9   :  { %v1544_v56 = vpop.f32.mrf.mxu0 }
 0x1fa   :  { %v1545_v36 = vadd.f32 %v1544_v56, %v1401_v7 }
 0x1fb   :  { %v1546_v5 = vpop.f32.mrf.mxu0 }
 0x1fc   :  { %v1641_v40 = vadd.f32 %v1640_v29, %v1545_v36  ;;  %v1547_v57 = vadd.f32 %v1546_v5, %v1403_v18 }
 0x1fe   :  { %v1649_v16 = vmul.f32 1.442695, %v1641_v40  ;;  %v1643_v60 = vadd.f32 %v1642_v41, %v1547_v57 }
 0x200   :  { %1690 = vpow2.f32 %v1649_v16  ;;  %v1651_v46 = vmul.f32 1.442695, %v1643_v60 }
 0x202   :  { %1692 = vpow2.f32 %v1651_v46 }
 0x20d   :  { %v1691_v59 = vpop.eup %1690 }
 0x20e   :  { %1655 = vst [vmem:[#allocation7 + $0x10] sm:$0xff] %v1691_v59 }
 0x20f   :  { %v1693_v15 = vpop.eup %1692 }
 0x210   :  { %1656 = vst [vmem:[#allocation7 + $0x18] sm:$0xff] %v1693_v15 }
 0x211   :  { %1745 = shalt.err (!%p1742_p0)
}
 0x212   :  { %1666 = dma.vmem_to_hbm [thread:$0]  %s1664_s21, 512, %s2593_s2, [#allocation4]  }
 0x213   :  { %1758 = dma.done.wait [#allocation4], 512  }
 0x214   :  { %1759 = vsyncadd [#allocation4], 4294966784 }
 0x215   :  { %1670 = vsyncpa [#allocation3], 1 }
 0x216   :  { %1671 = vsyncpa [#allocation6], 1 }
 0x217   :  { %1672 = vsyncpa [#allocation4], 1 }

</bundles_post_ra>
